<compile_context>
chip_gen: v5e
topology: v5e:2x2
jax: 0.10.0
libtpu: 0.0.40
codegen_flags: <defaults>
</compile_context>

<pallas_src>
import functools

import jax
import jax.numpy as jnp
from jax import lax
from jax.experimental import pallas as pl
from jax.experimental.pallas import tpu as pltpu


# ---------------------------------------------------------------------------
# Fused kernel (one grid step per batch element)
# ---------------------------------------------------------------------------
def _fused_attn_kernel(A, Ah, PQ, Cq, C,
                       xq_ref, xkv_ref, wq_ref, bq_ref, wkv_ref, bkv_ref,
                       o_ref, qm_ref, kT_ref, vT_ref):
    M = Cq * PQ                    # flattened query/key feature dim
    n_hi = A // Cq
    half = Ah * PQ                 # = N // 2

    xq = xkv = None
    xq = xq_ref[0]                 # (C, N)  attn-transposed x, natural (a, pq) order
    xkv = xkv_ref[0]               # (C, N)  columns permuted to (parity, a2, d, g)

    # 1x1x1 Conv3d == channel matmul on the MXU (default precision, f32 acc).
    q = jnp.dot(wq_ref[...], xq, preferred_element_type=jnp.float32) + bq_ref[...]
    kv = jnp.dot(wkv_ref[...], xkv, preferred_element_type=jnp.float32) + bkv_ref[...]

    # --- query.view(B, A, -1): rows of Q_mat are contiguous M-chunks of q ----
    for c in range(Cq):
        for j in range(n_hi):
            r = c * n_hi + j
            qm_ref[r:r + 1, :] = q[c:c + 1, j * M:(j + 1) * M]

    # --- MaxPool3d((2,1,1),(2,1,1)) along A: with the (parity, a2, d, g)
    #     column order this is one max of the two N/2 halves. -----------------
    pooled = jnp.maximum(kv[:, :half], kv[:, half:])            # (Cq+C, Ah*PQ)

    # --- key/value .view(B, -1, A//2), emitted directly in the transposed
    #     (Ah, M) / (Ah, R) layouts: each attention column a2 is a contiguous
    #     PQ-wide chunk per channel. -------------------------------------------
    for a2 in range(Ah):
        chunk = pooled[:, a2 * PQ:(a2 + 1) * PQ]                # (Cq+C, PQ)
        for h in range(Cq):        # key channels
            kT_ref[a2:a2 + 1, h * PQ:(h + 1) * PQ] = chunk[h:h + 1, :]
        for cc in range(C):        # value channels
            vT_ref[a2:a2 + 1, cc * PQ:(cc + 1) * PQ] = chunk[Cq + cc:Cq + cc + 1, :]

    # --- dist = Q @ K, softmax, out^T = attn @ V^T (R on lanes) --------------
    dist = lax.dot_general(qm_ref[...], kT_ref[...], (((1,), (1,)), ((), ())),
                           preferred_element_type=jnp.float32)  # (A, Ah)
    dist = dist - jnp.max(dist, axis=-1, keepdims=True)
    e = jnp.exp(dist)
    attn = e * pl.reciprocal(jnp.sum(e, axis=-1, keepdims=True), approx=True)
    out_t = jnp.dot(attn, vT_ref[...], preferred_element_type=jnp.float32)   # (A, R)
    o_ref[0] = out_t.astype(o_ref.dtype)


# ---------------------------------------------------------------------------
# Wrapper (attn-axis transpose, kv column permutation, final view/permute,
# gamma * out + x -- all plain XLA on x / the final output only)
# ---------------------------------------------------------------------------
def separable_attn_cell(x, params, attn_id='H', pooling_factor=2):
    # TODO(synk): only pooling_factor == 2 (the module default) is implemented.
    assert pooling_factor == 2
    B, C, T, W, H = x.shape
    assert T % 2 == 0 and W % 2 == 0 and H % 2 == 0, "T, W, H is not even"
    assert attn_id in ('T', 'W', 'H')

    if attn_id == 'T':
        xt = x
    elif attn_id == 'W':
        xt = jnp.swapaxes(x, 2, 3)
    else:                                    # 'H' (also the module's None path)
        xt = jnp.swapaxes(x, 2, 4)

    A, P, Q = xt.shape[2], xt.shape[3], xt.shape[4]
    PQ, N = P * Q, A * P * Q
    Ah = A // 2
    Cq = C // 2
    M = Cq * PQ
    R = C * PQ
    # TODO(synk): the in-kernel raw-view regrouping assumes these divisibilities
    # (they hold for the module's usual even / cubic inputs).
    assert A % Cq == 0 and PQ % Ah == 0
    G = PQ // Ah

    # Two layouts of the attn-transposed input:
    #   x_q : natural (a, pq) column order  -> query projection / raw query view.
    #   x_kv: columns ordered (parity, a2, d, g) with a = 2d+parity,
    #         pq = g*Ah + a2, so the pool is one wide max and the raw key/value
    #         views become contiguous PQ-wide chunks inside the kernel.
    x_q = xt.reshape(B, C, N)
    x_kv = (xt.reshape(B, C, Ah, 2, G, Ah)       # (B, C, d, parity, g, a2)
              .transpose(0, 1, 3, 5, 2, 4)       # (B, C, parity, a2, d, g)
              .reshape(B, C, N))

    wq, bq = params['wq'], params['bq']
    wkv = jnp.concatenate([params['wk'], params['wv']], axis=0)   # (Cq + C, C)
    bkv = jnp.concatenate([params['bk'], params['bv']], axis=0)   # (Cq + C, 1)

    kern = functools.partial(_fused_attn_kernel, A, Ah, PQ, Cq, C)
    out_t = pl.pallas_call(
        kern,
        grid=(B,),
        in_specs=[
            pl.BlockSpec((1, C, N), lambda b: (b, 0, 0)),
            pl.BlockSpec((1, C, N), lambda b: (b, 0, 0)),
            pl.BlockSpec((Cq, C), lambda b: (0, 0)),
            pl.BlockSpec((Cq, 1), lambda b: (0, 0)),
            pl.BlockSpec((Cq + C, C), lambda b: (0, 0)),
            pl.BlockSpec((Cq + C, 1), lambda b: (0, 0)),
        ],
        out_specs=pl.BlockSpec((1, A, R), lambda b: (b, 0, 0)),
        out_shape=jax.ShapeDtypeStruct((B, A, R), x.dtype),
        scratch_shapes=[
            pltpu.VMEM((A, M), jnp.float32),    # raw-view Q_mat
            pltpu.VMEM((Ah, M), jnp.float32),   # raw-view K^T
            pltpu.VMEM((Ah, R), jnp.float32),   # raw-view V^T
        ],
        compiler_params=pltpu.CompilerParams(
            dimension_semantics=("parallel",)),
    )(x_q, x_kv, wq, bq, wkv, bkv)

    # out_t (B, A, R) is the transpose of the torch bmm output (B, R, A).
    out_res = jnp.swapaxes(out_t, 1, 2)
    if attn_id == 'T':
        out = out_res.reshape(B, C, W, H, T).transpose(0, 1, 4, 2, 3)
    elif attn_id == 'W':
        out = out_res.reshape(B, C, T, H, W).transpose(0, 1, 2, 4, 3)
    else:
        out = out_res.reshape(B, C, T, W, H)
    gamma = params['gamma'].reshape(())
    return gamma * out + x


# ---------------------------------------------------------------------------
# Deterministic parameter init (shapes from the module's __init__)
# ---------------------------------------------------------------------------
def init_params(key, in_dim):
    ks = jax.random.split(key, 6)
    cq = in_dim // 2
    scale = 0.2
    return dict(
        wq=jax.random.normal(ks[0], (cq, in_dim), jnp.float32) * scale,
        bq=jax.random.normal(ks[1], (cq, 1), jnp.float32) * scale,
        wk=jax.random.normal(ks[2], (cq, in_dim), jnp.float32) * scale,
        bk=jax.random.normal(ks[3], (cq, 1), jnp.float32) * scale,
        wv=jax.random.normal(ks[4], (in_dim, in_dim), jnp.float32) * scale,
        bv=jax.random.normal(ks[5], (in_dim, 1), jnp.float32) * scale,
        # nn.Parameter(torch.zeros((1,))) in PyTorch; set nonzero so the
        # attention path actually contributes to the output.
        gamma=jnp.full((1,), 0.5, jnp.float32),
    )


# ---------------------------------------------------------------------------
# Pure-JAX reference that mirrors the PyTorch forward literally.
# ---------------------------------------------------------------------------
def reference(x, params, attn_id):
    B, C, T, W, H = x.shape
    if attn_id == 'T':
        out = x
    elif attn_id == 'W':
        out = jnp.swapaxes(x, 2, 3)
    else:
        out = jnp.swapaxes(x, 2, 4)
    A = out.shape[2]

    def conv1(t, w, b):
        return jnp.einsum('oc,bcapq->boapq', w, t) + b.reshape(1, -1, 1, 1, 1)

    def pool(t):
        Bq, Co, Aq, Pq, Qq = t.shape
        return jnp.max(t.reshape(Bq, Co, Aq // 2, 2, Pq, Qq), axis=3)

    query = conv1(out, params['wq'], params['bq']).reshape(B, A, -1)
    key = pool(conv1(out, params['wk'], params['bk'])).reshape(B, -1, A // 2)
    dist = jnp.einsum('bij,bjk->bik', query, key)
    attn = jax.nn.softmax(dist, axis=-1)
    value = pool(conv1(out, params['wv'], params['bv'])).reshape(B, -1, A // 2)
    o = jnp.einsum('bij,bkj->bik', value, attn)
    if attn_id == 'T':
        o = o.reshape(B, C, W, H, T).transpose(0, 1, 4, 2, 3)
    elif attn_id == 'W':
        o = o.reshape(B, C, T, H, W).transpose(0, 1, 2, 4, 3)
    else:
        o = o.reshape(B, C, T, W, H)
    return params['gamma'].reshape(()) * o + x


if __name__ == "__main__":
    key = jax.random.PRNGKey(0)
    kx, kp_ = jax.random.split(key)
    B, C, T, W, H = 2, 4, 8, 8, 8
    x = jax.random.normal(kx, (B, C, T, W, H), jnp.float32)
    params = init_params(kp_, C)

    for attn_id in ('T', 'W', 'H'):
        fn = jax.jit(functools.partial(separable_attn_cell, attn_id=attn_id))
        out = jax.block_until_ready(fn(x, params))
        assert out.shape == x.shape
        assert bool(jnp.all(jnp.isfinite(out)))
        ref = reference(x, params, attn_id)
        assert bool(jnp.allclose(out, ref, atol=2e-2, rtol=2e-2)), \
            f"mismatch for attn_id={attn_id}"

    print("KERNEL_OK")
</pallas_src>

<mosaic_0001>
module attributes {stable_mosaic.version = 11 : i64} {
  func.func @_fused_attn_kernel(%arg0: i32, %arg1: memref<1x4x512xf32, #tpu.memory_space<vmem>>, %arg2: memref<1x4x512xf32, #tpu.memory_space<vmem>>, %arg3: memref<2x4xf32, #tpu.memory_space<vmem>>, %arg4: memref<2x1xf32, #tpu.memory_space<vmem>>, %arg5: memref<6x4xf32, #tpu.memory_space<vmem>>, %arg6: memref<6x1xf32, #tpu.memory_space<vmem>>, %arg7: memref<1x8x256xf32, #tpu.memory_space<vmem>>, %arg8: memref<8x128xf32, #tpu.memory_space<vmem>>, %arg9: memref<4x128xf32, #tpu.memory_space<vmem>>, %arg10: memref<4x256xf32, #tpu.memory_space<vmem>>) attributes {dimension_semantics = [#tpu.dimension_semantics<parallel>], iteration_bounds = array<i64: 2>, scalar_prefetch = 0 : i64, scratch_operands = 3 : i64, tpu.core_type = #tpu.core_type<tc>, window_params = [{transform_indices = @transform_0, window_bounds = array<i64: 1, 4, 512>}, {transform_indices = @transform_1, window_bounds = array<i64: 1, 4, 512>}, {pipeline_mode = #tpu.pipeline_mode<synchronous>, transform_indices = @transform_2, window_bounds = array<i64: 2, 4>}, {pipeline_mode = #tpu.pipeline_mode<synchronous>, transform_indices = @transform_3, window_bounds = array<i64: 2, 1>}, {pipeline_mode = #tpu.pipeline_mode<synchronous>, transform_indices = @transform_4, window_bounds = array<i64: 6, 4>}, {pipeline_mode = #tpu.pipeline_mode<synchronous>, transform_indices = @transform_5, window_bounds = array<i64: 6, 1>}, {transform_indices = @transform_6, window_bounds = array<i64: 1, 8, 256>}]} {
    %c0 = arith.constant 0 : index
    %c0_0 = arith.constant 0 : index
    %c0_1 = arith.constant 0 : index
    %0 = vector.load %arg1[%c0, %c0_0, %c0_1] : memref<1x4x512xf32, #tpu.memory_space<vmem>>, vector<1x4x512xf32>
    %1 = vector.shape_cast %0 : vector<1x4x512xf32> to vector<4x512xf32>
    %c0_2 = arith.constant 0 : index
    %c0_3 = arith.constant 0 : index
    %c0_4 = arith.constant 0 : index
    %2 = vector.load %arg2[%c0_2, %c0_3, %c0_4] : memref<1x4x512xf32, #tpu.memory_space<vmem>>, vector<1x4x512xf32>
    %3 = vector.shape_cast %2 : vector<1x4x512xf32> to vector<4x512xf32>
    %c0_5 = arith.constant 0 : index
    %c0_6 = arith.constant 0 : index
    %4 = vector.load %arg3[%c0_5, %c0_6] : memref<2x4xf32, #tpu.memory_space<vmem>>, vector<2x4xf32>
    %cst = arith.constant dense<0.000000e+00> : vector<2x512xf32>
    %5 = tpu.matmul %4, %1, %cst {dimension_numbers = #tpu.dot_dimension_numbers<[1], [0], [0], [1], [0, 0, 1, 1], [], []>} : vector<2x4xf32>, vector<4x512xf32>, vector<2x512xf32> -> vector<2x512xf32>
    %c0_7 = arith.constant 0 : index
    %c0_8 = arith.constant 0 : index
    %6 = vector.load %arg4[%c0_7, %c0_8] : memref<2x1xf32, #tpu.memory_space<vmem>>, vector<2x1xf32>
    %7 = vector.broadcast %6 : vector<2x1xf32> to vector<2x512xf32>
    %8 = arith.addf %5, %7 : vector<2x512xf32>
    %c0_9 = arith.constant 0 : index
    %c0_10 = arith.constant 0 : index
    %9 = vector.load %arg5[%c0_9, %c0_10] : memref<6x4xf32, #tpu.memory_space<vmem>>, vector<6x4xf32>
    %cst_11 = arith.constant dense<0.000000e+00> : vector<6x512xf32>
    %10 = tpu.matmul %9, %3, %cst_11 {dimension_numbers = #tpu.dot_dimension_numbers<[1], [0], [0], [1], [0, 0, 1, 1], [], []>} : vector<6x4xf32>, vector<4x512xf32>, vector<6x512xf32> -> vector<6x512xf32>
    %c0_12 = arith.constant 0 : index
    %c0_13 = arith.constant 0 : index
    %11 = vector.load %arg6[%c0_12, %c0_13] : memref<6x1xf32, #tpu.memory_space<vmem>>, vector<6x1xf32>
    %12 = vector.broadcast %11 : vector<6x1xf32> to vector<6x512xf32>
    %13 = arith.addf %10, %12 : vector<6x512xf32>
    %14 = vector.extract_strided_slice %8 {offsets = [0, 0], sizes = [1, 128], strides = [1, 1]} : vector<2x512xf32> to vector<1x128xf32>
    %c0_14 = arith.constant 0 : index
    %c0_15 = arith.constant 0 : index
    %15 = vector.load %arg8[%c0_14, %c0_15] : memref<8x128xf32, #tpu.memory_space<vmem>>, vector<1x128xf32>
    tpu.vector_store %arg8[%c0_14, %c0_15], %14 {strides = array<i32>} : memref<8x128xf32, #tpu.memory_space<vmem>>, vector<1x128xf32>,
    %16 = vector.extract_strided_slice %8 {offsets = [0, 128], sizes = [1, 128], strides = [1, 1]} : vector<2x512xf32> to vector<1x128xf32>
    %c1 = arith.constant 1 : index
    %c0_16 = arith.constant 0 : index
    %17 = vector.load %arg8[%c1, %c0_16] : memref<8x128xf32, #tpu.memory_space<vmem>>, vector<1x128xf32>
    tpu.vector_store %arg8[%c1, %c0_16], %16 {strides = array<i32>} : memref<8x128xf32, #tpu.memory_space<vmem>>, vector<1x128xf32>,
    %18 = vector.extract_strided_slice %8 {offsets = [0, 256], sizes = [1, 128], strides = [1, 1]} : vector<2x512xf32> to vector<1x128xf32>
    %c2 = arith.constant 2 : index
    %c0_17 = arith.constant 0 : index
    %19 = vector.load %arg8[%c2, %c0_17] : memref<8x128xf32, #tpu.memory_space<vmem>>, vector<1x128xf32>
    tpu.vector_store %arg8[%c2, %c0_17], %18 {strides = array<i32>} : memref<8x128xf32, #tpu.memory_space<vmem>>, vector<1x128xf32>,
    %20 = vector.extract_strided_slice %8 {offsets = [0, 384], sizes = [1, 128], strides = [1, 1]} : vector<2x512xf32> to vector<1x128xf32>
    %c3 = arith.constant 3 : index
    %c0_18 = arith.constant 0 : index
    %21 = vector.load %arg8[%c3, %c0_18] : memref<8x128xf32, #tpu.memory_space<vmem>>, vector<1x128xf32>
    tpu.vector_store %arg8[%c3, %c0_18], %20 {strides = array<i32>} : memref<8x128xf32, #tpu.memory_space<vmem>>, vector<1x128xf32>,
    %22 = vector.extract_strided_slice %8 {offsets = [1, 0], sizes = [1, 128], strides = [1, 1]} : vector<2x512xf32> to vector<1x128xf32>
    %c4 = arith.constant 4 : index
    %c0_19 = arith.constant 0 : index
    %23 = vector.load %arg8[%c4, %c0_19] : memref<8x128xf32, #tpu.memory_space<vmem>>, vector<1x128xf32>
    tpu.vector_store %arg8[%c4, %c0_19], %22 {strides = array<i32>} : memref<8x128xf32, #tpu.memory_space<vmem>>, vector<1x128xf32>,
    %24 = vector.extract_strided_slice %8 {offsets = [1, 128], sizes = [1, 128], strides = [1, 1]} : vector<2x512xf32> to vector<1x128xf32>
    %c5 = arith.constant 5 : index
    %c0_20 = arith.constant 0 : index
    %25 = vector.load %arg8[%c5, %c0_20] : memref<8x128xf32, #tpu.memory_space<vmem>>, vector<1x128xf32>
    tpu.vector_store %arg8[%c5, %c0_20], %24 {strides = array<i32>} : memref<8x128xf32, #tpu.memory_space<vmem>>, vector<1x128xf32>,
    %26 = vector.extract_strided_slice %8 {offsets = [1, 256], sizes = [1, 128], strides = [1, 1]} : vector<2x512xf32> to vector<1x128xf32>
    %c6 = arith.constant 6 : index
    %c0_21 = arith.constant 0 : index
    %27 = vector.load %arg8[%c6, %c0_21] : memref<8x128xf32, #tpu.memory_space<vmem>>, vector<1x128xf32>
    tpu.vector_store %arg8[%c6, %c0_21], %26 {strides = array<i32>} : memref<8x128xf32, #tpu.memory_space<vmem>>, vector<1x128xf32>,
    %28 = vector.extract_strided_slice %8 {offsets = [1, 384], sizes = [1, 128], strides = [1, 1]} : vector<2x512xf32> to vector<1x128xf32>
    %c7 = arith.constant 7 : index
    %c0_22 = arith.constant 0 : index
    %29 = vector.load %arg8[%c7, %c0_22] : memref<8x128xf32, #tpu.memory_space<vmem>>, vector<1x128xf32>
    tpu.vector_store %arg8[%c7, %c0_22], %28 {strides = array<i32>} : memref<8x128xf32, #tpu.memory_space<vmem>>, vector<1x128xf32>,
    %30 = vector.extract_strided_slice %13 {offsets = [0, 0], sizes = [6, 256], strides = [1, 1]} : vector<6x512xf32> to vector<6x256xf32>
    %31 = vector.extract_strided_slice %13 {offsets = [0, 256], sizes = [6, 256], strides = [1, 1]} : vector<6x512xf32> to vector<6x256xf32>
    %32 = arith.maximumf %30, %31 : vector<6x256xf32>
    %33 = vector.extract_strided_slice %32 {offsets = [0, 0], sizes = [6, 64], strides = [1, 1]} : vector<6x256xf32> to vector<6x64xf32>
    %34 = vector.extract_strided_slice %33 {offsets = [0, 0], sizes = [1, 64], strides = [1, 1]} : vector<6x64xf32> to vector<1x64xf32>
    %c0_23 = arith.constant 0 : index
    %c0_24 = arith.constant 0 : index
    %35 = vector.load %arg9[%c0_23, %c0_24] : memref<4x128xf32, #tpu.memory_space<vmem>>, vector<1x64xf32>
    tpu.vector_store %arg9[%c0_23, %c0_24], %34 {strides = array<i32>} : memref<4x128xf32, #tpu.memory_space<vmem>>, vector<1x64xf32>,
    %36 = vector.extract_strided_slice %33 {offsets = [1, 0], sizes = [1, 64], strides = [1, 1]} : vector<6x64xf32> to vector<1x64xf32>
    %c0_25 = arith.constant 0 : index
    %c64 = arith.constant 64 : index
    %37 = vector.load %arg9[%c0_25, %c64] : memref<4x128xf32, #tpu.memory_space<vmem>>, vector<1x64xf32>
    tpu.vector_store %arg9[%c0_25, %c64], %36 {strides = array<i32>} : memref<4x128xf32, #tpu.memory_space<vmem>>, vector<1x64xf32>,
    %38 = vector.extract_strided_slice %33 {offsets = [2, 0], sizes = [1, 64], strides = [1, 1]} : vector<6x64xf32> to vector<1x64xf32>
    %c0_26 = arith.constant 0 : index
    %c0_27 = arith.constant 0 : index
    %39 = vector.load %arg10[%c0_26, %c0_27] : memref<4x256xf32, #tpu.memory_space<vmem>>, vector<1x64xf32>
    tpu.vector_store %arg10[%c0_26, %c0_27], %38 {strides = array<i32>} : memref<4x256xf32, #tpu.memory_space<vmem>>, vector<1x64xf32>,
    %40 = vector.extract_strided_slice %33 {offsets = [3, 0], sizes = [1, 64], strides = [1, 1]} : vector<6x64xf32> to vector<1x64xf32>
    %c0_28 = arith.constant 0 : index
    %c64_29 = arith.constant 64 : index
    %41 = vector.load %arg10[%c0_28, %c64_29] : memref<4x256xf32, #tpu.memory_space<vmem>>, vector<1x64xf32>
    tpu.vector_store %arg10[%c0_28, %c64_29], %40 {strides = array<i32>} : memref<4x256xf32, #tpu.memory_space<vmem>>, vector<1x64xf32>,
    %42 = vector.extract_strided_slice %33 {offsets = [4, 0], sizes = [1, 64], strides = [1, 1]} : vector<6x64xf32> to vector<1x64xf32>
    %c0_30 = arith.constant 0 : index
    %c128 = arith.constant 128 : index
    %43 = vector.load %arg10[%c0_30, %c128] : memref<4x256xf32, #tpu.memory_space<vmem>>, vector<1x64xf32>
    tpu.vector_store %arg10[%c0_30, %c128], %42 {strides = array<i32>} : memref<4x256xf32, #tpu.memory_space<vmem>>, vector<1x64xf32>,
    %44 = vector.extract_strided_slice %33 {offsets = [5, 0], sizes = [1, 64], strides = [1, 1]} : vector<6x64xf32> to vector<1x64xf32>
    %c0_31 = arith.constant 0 : index
    %c192 = arith.constant 192 : index
    %45 = vector.load %arg10[%c0_31, %c192] : memref<4x256xf32, #tpu.memory_space<vmem>>, vector<1x64xf32>
    tpu.vector_store %arg10[%c0_31, %c192], %44 {strides = array<i32>} : memref<4x256xf32, #tpu.memory_space<vmem>>, vector<1x64xf32>,
    %46 = vector.extract_strided_slice %32 {offsets = [0, 64], sizes = [6, 64], strides = [1, 1]} : vector<6x256xf32> to vector<6x64xf32>
    %47 = vector.extract_strided_slice %46 {offsets = [0, 0], sizes = [1, 64], strides = [1, 1]} : vector<6x64xf32> to vector<1x64xf32>
    %c1_32 = arith.constant 1 : index
    %c0_33 = arith.constant 0 : index
    %48 = vector.load %arg9[%c1_32, %c0_33] : memref<4x128xf32, #tpu.memory_space<vmem>>, vector<1x64xf32>
    tpu.vector_store %arg9[%c1_32, %c0_33], %47 {strides = array<i32>} : memref<4x128xf32, #tpu.memory_space<vmem>>, vector<1x64xf32>,
    %49 = vector.extract_strided_slice %46 {offsets = [1, 0], sizes = [1, 64], strides = [1, 1]} : vector<6x64xf32> to vector<1x64xf32>
    %c1_34 = arith.constant 1 : index
    %c64_35 = arith.constant 64 : index
    %50 = vector.load %arg9[%c1_34, %c64_35] : memref<4x128xf32, #tpu.memory_space<vmem>>, vector<1x64xf32>
    tpu.vector_store %arg9[%c1_34, %c64_35], %49 {strides = array<i32>} : memref<4x128xf32, #tpu.memory_space<vmem>>, vector<1x64xf32>,
    %51 = vector.extract_strided_slice %46 {offsets = [2, 0], sizes = [1, 64], strides = [1, 1]} : vector<6x64xf32> to vector<1x64xf32>
    %c1_36 = arith.constant 1 : index
    %c0_37 = arith.constant 0 : index
    %52 = vector.load %arg10[%c1_36, %c0_37] : memref<4x256xf32, #tpu.memory_space<vmem>>, vector<1x64xf32>
    tpu.vector_store %arg10[%c1_36, %c0_37], %51 {strides = array<i32>} : memref<4x256xf32, #tpu.memory_space<vmem>>, vector<1x64xf32>,
    %53 = vector.extract_strided_slice %46 {offsets = [3, 0], sizes = [1, 64], strides = [1, 1]} : vector<6x64xf32> to vector<1x64xf32>
    %c1_38 = arith.constant 1 : index
    %c64_39 = arith.constant 64 : index
    %54 = vector.load %arg10[%c1_38, %c64_39] : memref<4x256xf32, #tpu.memory_space<vmem>>, vector<1x64xf32>
    tpu.vector_store %arg10[%c1_38, %c64_39], %53 {strides = array<i32>} : memref<4x256xf32, #tpu.memory_space<vmem>>, vector<1x64xf32>,
    %55 = vector.extract_strided_slice %46 {offsets = [4, 0], sizes = [1, 64], strides = [1, 1]} : vector<6x64xf32> to vector<1x64xf32>
    %c1_40 = arith.constant 1 : index
    %c128_41 = arith.constant 128 : index
    %56 = vector.load %arg10[%c1_40, %c128_41] : memref<4x256xf32, #tpu.memory_space<vmem>>, vector<1x64xf32>
    tpu.vector_store %arg10[%c1_40, %c128_41], %55 {strides = array<i32>} : memref<4x256xf32, #tpu.memory_space<vmem>>, vector<1x64xf32>,
    %57 = vector.extract_strided_slice %46 {offsets = [5, 0], sizes = [1, 64], strides = [1, 1]} : vector<6x64xf32> to vector<1x64xf32>
    %c1_42 = arith.constant 1 : index
    %c192_43 = arith.constant 192 : index
    %58 = vector.load %arg10[%c1_42, %c192_43] : memref<4x256xf32, #tpu.memory_space<vmem>>, vector<1x64xf32>
    tpu.vector_store %arg10[%c1_42, %c192_43], %57 {strides = array<i32>} : memref<4x256xf32, #tpu.memory_space<vmem>>, vector<1x64xf32>,
    %59 = vector.extract_strided_slice %32 {offsets = [0, 128], sizes = [6, 64], strides = [1, 1]} : vector<6x256xf32> to vector<6x64xf32>
    %60 = vector.extract_strided_slice %59 {offsets = [0, 0], sizes = [1, 64], strides = [1, 1]} : vector<6x64xf32> to vector<1x64xf32>
    %c2_44 = arith.constant 2 : index
    %c0_45 = arith.constant 0 : index
    %61 = vector.load %arg9[%c2_44, %c0_45] : memref<4x128xf32, #tpu.memory_space<vmem>>, vector<1x64xf32>
    tpu.vector_store %arg9[%c2_44, %c0_45], %60 {strides = array<i32>} : memref<4x128xf32, #tpu.memory_space<vmem>>, vector<1x64xf32>,
    %62 = vector.extract_strided_slice %59 {offsets = [1, 0], sizes = [1, 64], strides = [1, 1]} : vector<6x64xf32> to vector<1x64xf32>
    %c2_46 = arith.constant 2 : index
    %c64_47 = arith.constant 64 : index
    %63 = vector.load %arg9[%c2_46, %c64_47] : memref<4x128xf32, #tpu.memory_space<vmem>>, vector<1x64xf32>
    tpu.vector_store %arg9[%c2_46, %c64_47], %62 {strides = array<i32>} : memref<4x128xf32, #tpu.memory_space<vmem>>, vector<1x64xf32>,
    %64 = vector.extract_strided_slice %59 {offsets = [2, 0], sizes = [1, 64], strides = [1, 1]} : vector<6x64xf32> to vector<1x64xf32>
    %c2_48 = arith.constant 2 : index
    %c0_49 = arith.constant 0 : index
    %65 = vector.load %arg10[%c2_48, %c0_49] : memref<4x256xf32, #tpu.memory_space<vmem>>, vector<1x64xf32>
    tpu.vector_store %arg10[%c2_48, %c0_49], %64 {strides = array<i32>} : memref<4x256xf32, #tpu.memory_space<vmem>>, vector<1x64xf32>,
    %66 = vector.extract_strided_slice %59 {offsets = [3, 0], sizes = [1, 64], strides = [1, 1]} : vector<6x64xf32> to vector<1x64xf32>
    %c2_50 = arith.constant 2 : index
    %c64_51 = arith.constant 64 : index
    %67 = vector.load %arg10[%c2_50, %c64_51] : memref<4x256xf32, #tpu.memory_space<vmem>>, vector<1x64xf32>
    tpu.vector_store %arg10[%c2_50, %c64_51], %66 {strides = array<i32>} : memref<4x256xf32, #tpu.memory_space<vmem>>, vector<1x64xf32>,
    %68 = vector.extract_strided_slice %59 {offsets = [4, 0], sizes = [1, 64], strides = [1, 1]} : vector<6x64xf32> to vector<1x64xf32>
    %c2_52 = arith.constant 2 : index
    %c128_53 = arith.constant 128 : index
    %69 = vector.load %arg10[%c2_52, %c128_53] : memref<4x256xf32, #tpu.memory_space<vmem>>, vector<1x64xf32>
    tpu.vector_store %arg10[%c2_52, %c128_53], %68 {strides = array<i32>} : memref<4x256xf32, #tpu.memory_space<vmem>>, vector<1x64xf32>,
    %70 = vector.extract_strided_slice %59 {offsets = [5, 0], sizes = [1, 64], strides = [1, 1]} : vector<6x64xf32> to vector<1x64xf32>
    %c2_54 = arith.constant 2 : index
    %c192_55 = arith.constant 192 : index
    %71 = vector.load %arg10[%c2_54, %c192_55] : memref<4x256xf32, #tpu.memory_space<vmem>>, vector<1x64xf32>
    tpu.vector_store %arg10[%c2_54, %c192_55], %70 {strides = array<i32>} : memref<4x256xf32, #tpu.memory_space<vmem>>, vector<1x64xf32>,
    %72 = vector.extract_strided_slice %32 {offsets = [0, 192], sizes = [6, 64], strides = [1, 1]} : vector<6x256xf32> to vector<6x64xf32>
    %73 = vector.extract_strided_slice %72 {offsets = [0, 0], sizes = [1, 64], strides = [1, 1]} : vector<6x64xf32> to vector<1x64xf32>
    %c3_56 = arith.constant 3 : index
    %c0_57 = arith.constant 0 : index
    %74 = vector.load %arg9[%c3_56, %c0_57] : memref<4x128xf32, #tpu.memory_space<vmem>>, vector<1x64xf32>
    tpu.vector_store %arg9[%c3_56, %c0_57], %73 {strides = array<i32>} : memref<4x128xf32, #tpu.memory_space<vmem>>, vector<1x64xf32>,
    %75 = vector.extract_strided_slice %72 {offsets = [1, 0], sizes = [1, 64], strides = [1, 1]} : vector<6x64xf32> to vector<1x64xf32>
    %c3_58 = arith.constant 3 : index
    %c64_59 = arith.constant 64 : index
    %76 = vector.load %arg9[%c3_58, %c64_59] : memref<4x128xf32, #tpu.memory_space<vmem>>, vector<1x64xf32>
    tpu.vector_store %arg9[%c3_58, %c64_59], %75 {strides = array<i32>} : memref<4x128xf32, #tpu.memory_space<vmem>>, vector<1x64xf32>,
    %77 = vector.extract_strided_slice %72 {offsets = [2, 0], sizes = [1, 64], strides = [1, 1]} : vector<6x64xf32> to vector<1x64xf32>
    %c3_60 = arith.constant 3 : index
    %c0_61 = arith.constant 0 : index
    %78 = vector.load %arg10[%c3_60, %c0_61] : memref<4x256xf32, #tpu.memory_space<vmem>>, vector<1x64xf32>
    tpu.vector_store %arg10[%c3_60, %c0_61], %77 {strides = array<i32>} : memref<4x256xf32, #tpu.memory_space<vmem>>, vector<1x64xf32>,
    %79 = vector.extract_strided_slice %72 {offsets = [3, 0], sizes = [1, 64], strides = [1, 1]} : vector<6x64xf32> to vector<1x64xf32>
    %c3_62 = arith.constant 3 : index
    %c64_63 = arith.constant 64 : index
    %80 = vector.load %arg10[%c3_62, %c64_63] : memref<4x256xf32, #tpu.memory_space<vmem>>, vector<1x64xf32>
    tpu.vector_store %arg10[%c3_62, %c64_63], %79 {strides = array<i32>} : memref<4x256xf32, #tpu.memory_space<vmem>>, vector<1x64xf32>,
    %81 = vector.extract_strided_slice %72 {offsets = [4, 0], sizes = [1, 64], strides = [1, 1]} : vector<6x64xf32> to vector<1x64xf32>
    %c3_64 = arith.constant 3 : index
    %c128_65 = arith.constant 128 : index
    %82 = vector.load %arg10[%c3_64, %c128_65] : memref<4x256xf32, #tpu.memory_space<vmem>>, vector<1x64xf32>
    tpu.vector_store %arg10[%c3_64, %c128_65], %81 {strides = array<i32>} : memref<4x256xf32, #tpu.memory_space<vmem>>, vector<1x64xf32>,
    %83 = vector.extract_strided_slice %72 {offsets = [5, 0], sizes = [1, 64], strides = [1, 1]} : vector<6x64xf32> to vector<1x64xf32>
    %c3_66 = arith.constant 3 : index
    %c192_67 = arith.constant 192 : index
    %84 = vector.load %arg10[%c3_66, %c192_67] : memref<4x256xf32, #tpu.memory_space<vmem>>, vector<1x64xf32>
    tpu.vector_store %arg10[%c3_66, %c192_67], %83 {strides = array<i32>} : memref<4x256xf32, #tpu.memory_space<vmem>>, vector<1x64xf32>,
    %c0_68 = arith.constant 0 : index
    %c0_69 = arith.constant 0 : index
    %85 = vector.load %arg8[%c0_68, %c0_69] : memref<8x128xf32, #tpu.memory_space<vmem>>, vector<8x128xf32>
    %c0_70 = arith.constant 0 : index
    %c0_71 = arith.constant 0 : index
    %86 = vector.load %arg9[%c0_70, %c0_71] : memref<4x128xf32, #tpu.memory_space<vmem>>, vector<4x128xf32>
    %cst_72 = arith.constant dense<0.000000e+00> : vector<8x4xf32>
    %87 = tpu.matmul %85, %86, %cst_72 {dimension_numbers = #tpu.dot_dimension_numbers<[1], [1], [0], [0], [0, 0, 1, 0], [], []>} : vector<8x128xf32>, vector<4x128xf32>, vector<8x4xf32> -> vector<8x4xf32>
    %cst_73 = arith.constant dense<0xFF800000> : vector<8xf32>
    %88 = vector.multi_reduction <maximumf>, %87, %cst_73 [1] : vector<8x4xf32> to vector<8xf32>
    %89 = vector.shape_cast %88 : vector<8xf32> to vector<8x1xf32>
    %90 = vector.broadcast %89 : vector<8x1xf32> to vector<8x4xf32>
    %91 = arith.subf %87, %90 : vector<8x4xf32>
    %92 = math.exp %91 : vector<8x4xf32>
    %cst_74 = arith.constant dense<0.000000e+00> : vector<8xf32>
    %93 = vector.multi_reduction <add>, %92, %cst_74 [1] : vector<8x4xf32> to vector<8xf32>
    %94 = vector.shape_cast %93 : vector<8xf32> to vector<8x1xf32>
    %95 = tpu.reciprocal %94 {approx = true} : vector<8x1xf32> -> vector<8x1xf32>
    %96 = vector.broadcast %95 : vector<8x1xf32> to vector<8x4xf32>
    %97 = arith.mulf %92, %96 : vector<8x4xf32>
    %c0_75 = arith.constant 0 : index
    %c0_76 = arith.constant 0 : index
    %98 = vector.load %arg10[%c0_75, %c0_76] : memref<4x256xf32, #tpu.memory_space<vmem>>, vector<4x256xf32>
    %cst_77 = arith.constant dense<0.000000e+00> : vector<8x256xf32>
    %99 = tpu.matmul %97, %98, %cst_77 {dimension_numbers = #tpu.dot_dimension_numbers<[1], [0], [0], [1], [0, 0, 1, 1], [], []>} : vector<8x4xf32>, vector<4x256xf32>, vector<8x256xf32> -> vector<8x256xf32>
    %c0_78 = arith.constant 0 : index
    %c0_79 = arith.constant 0 : index
    %c0_80 = arith.constant 0 : index
    %100 = vector.load %arg7[%c0_78, %c0_79, %c0_80] : memref<1x8x256xf32, #tpu.memory_space<vmem>>, vector<1x8x256xf32>
    %101 = vector.shape_cast %100 : vector<1x8x256xf32> to vector<8x256xf32>
    %102 = vector.shape_cast %99 : vector<8x256xf32> to vector<1x8x256xf32>
    tpu.vector_store %arg7[%c0_78, %c0_79, %c0_80], %102 {strides = array<i32>} : memref<1x8x256xf32, #tpu.memory_space<vmem>>, vector<1x8x256xf32>,
    return
  }
  func.func @transform_0(%arg0: i32) -> (i32, i32, i32) {
    %c0_i32 = arith.constant 0 : i32
    %c0_i32_0 = arith.constant 0 : i32
    %c0_i32_1 = arith.constant 0 : i32
    return %arg0, %c0_i32, %c0_i32_0 : i32, i32, i32
  }
  func.func @transform_1(%arg0: i32) -> (i32, i32, i32) {
    %c0_i32 = arith.constant 0 : i32
    %c0_i32_0 = arith.constant 0 : i32
    %c0_i32_1 = arith.constant 0 : i32
    return %arg0, %c0_i32, %c0_i32_0 : i32, i32, i32
  }
  func.func @transform_2(%arg0: i32) -> (i32, i32) {
    %c0_i32 = arith.constant 0 : i32
    %c0_i32_0 = arith.constant 0 : i32
    %c0_i32_1 = arith.constant 0 : i32
    return %c0_i32, %c0_i32_0 : i32, i32
  }
  func.func @transform_3(%arg0: i32) -> (i32, i32) {
    %c0_i32 = arith.constant 0 : i32
    %c0_i32_0 = arith.constant 0 : i32
    %c0_i32_1 = arith.constant 0 : i32
    return %c0_i32, %c0_i32_0 : i32, i32
  }
  func.func @transform_4(%arg0: i32) -> (i32, i32) {
    %c0_i32 = arith.constant 0 : i32
    %c0_i32_0 = arith.constant 0 : i32
    %c0_i32_1 = arith.constant 0 : i32
    return %c0_i32, %c0_i32_0 : i32, i32
  }
  func.func @transform_5(%arg0: i32) -> (i32, i32) {
    %c0_i32 = arith.constant 0 : i32
    %c0_i32_0 = arith.constant 0 : i32
    %c0_i32_1 = arith.constant 0 : i32
    return %c0_i32, %c0_i32_0 : i32, i32
  }
  func.func @transform_6(%arg0: i32) -> (i32, i32, i32) {
    %c0_i32 = arith.constant 0 : i32
    %c0_i32_0 = arith.constant 0 : i32
    %c0_i32_1 = arith.constant 0 : i32
    return %arg0, %c0_i32, %c0_i32_0 : i32, i32, i32
  }
}

</mosaic_0001>

<bundles_post_ra>
// kernel: separable_attn_cell.1
= control target key start
LH: loop header
LB: loop body
LE: loop exit
PB: predicated region body
PF: predicated region fallthrough
CT: control target
= control target key end

     0   :  { %s864_s21 = smov 0   ;;  %s973_s0 = inlined_call_operand.vmem [shape: f32[2,4,512], index: 0, kind: input, shape index: {}]   ;;  %s974_s1 = inlined_call_operand.vmem [shape: f32[2,4,512], index: 1, kind: input, shape index: {}]   ;;  %s975_s2 = inlined_call_operand.vmem [shape: f32[2,4], index: 2, kind: input, shape index: {}]   ;;  %s976_s3 = inlined_call_operand.vmem [shape: f32[2,1], index: 3, kind: input, shape index: {}]   ;;  %s977_s4 = inlined_call_operand.vmem [shape: f32[6,4], index: 4, kind: input, shape index: {}]   ;;  %s978_s5 = inlined_call_operand.vmem [shape: f32[6,1], index: 5, kind: input, shape index: {}]   ;;  %s979_s6 = inlined_call_operand.vmem [shape: f32[2,8,256], index: 6, kind: output, shape index: {}]  }
   0x1 LB: > { %s763_s22 = sadd.s32 4294967295, %s825_s21   ;;  %p767_p0 = scmp.ge.s32.totalorder %s825_s21, 1  ;;  %s825_s21 = sphi %s864_s21, %s16_s21  }
   0x2   : > { %p222_p1 = scmp.lt.s32.totalorder %s825_s21, 3 }
   0x4   : > { %p223_p2 = pnand %p767_p0, %p222_p1 }
   0x5   : > { %p257_p3 = scmp.lt.s32.totalorder (!%p223_p2), %s763_s22, 1  ;;  %s828_s12 = smov (!%p223_p2), 64  }
   0x6   : > { %226 = sbr.rel (%p223_p2) target bundleno = 821 (0x335), region = 44 }
   0xb   : > { %v827_v0 = vmov 0   ;;  %v386_v1 = vld [vmem:[%s978_s5] sm:$0x3f]  ;;  %s981_s22 = smov (!%p257_p3, %s763_s22), 1  ;;  %vm296_vm0 = vcmask 1043456   ;;  %vm292_vm1 = vcmask 31744  }
   0xc   : > { %813 = vset.pattern.permute.xlu0 %v827_v0  ;;  %814 = vset.pattern.permute.xlu1 %v827_v0  ;;  %s875_s25 = sshll.u32 %s981_s22, 4  ;;  %v276_v5 = vld [vmem:[%s975_s2] sm:$0x3]  ;;  %vm502_vm2 = vcmask 516096   ;;  %vm508_vm3 = vcmask 1041921   ;;  %vm519_vm4 = vcmask 1040896  }
   0xd   : > { %389 = vperm.xlu0 %813, %v386_v1   ;;  %s261_s28 = scalar_lea.vmem %s973_s0, %s875_s25  ;;  %s266_s7 = scalar_lea.vmem %s974_s1, %s875_s25  ;;  %v385_v11 = vld [vmem:[%s977_s4] sm:$0x3f] }
   0xe   : > { %v273_v2 = vld [vmem:[%s261_s28 + $0x8] sm:$0xff]  ;;  %v272_v3 = vld [vmem:[%s261_s28] sm:$0xff]  ;;  %s271_s17 = scalar_lea.vmem %s979_s6, %s875_s25 }
   0xf   : > { %287 = vst [vmem:[#allocation1 + $0x10] ss:$2 sm:$0xff] %v273_v2  ;;  %v275_v4 = vld [vmem:[%s266_s7 + $0x8] sm:$0xff]  ;;  %v274_v6 = vld [vmem:[%s266_s7] sm:$0xff] }
  0x10   : > { %285 = vst [vmem:[#allocation1] ss:$2 sm:$0xff] %v272_v3  ;;  %v277_v35 = vld [vmem:[%s976_s3] sm:$0x3] }
  0x16   : > { %v290_v7 = vld.sshfl [vmem:[#allocation1 + $0x10] sm:$0xff pattern:$0x75316420]  ;;  %v291_v8 = vld.sshfl [vmem:[#allocation1 + $0x18] sm:$0xff pattern:$0x75316420] }
  0x17   : > { %778 = vmatpush.msk.msra.mxu2 %vm296_vm0, %v290_v7  ;;  %780 = vmatpush.msk.msra.mxu3 %vm296_vm0, %v291_v8  ;;  %396 = vst [vmem:[#allocation1 + $0x10] ss:$2 sm:$0xff] %v275_v4  ;;  %v288_v9 = vld.sshfl [vmem:[#allocation1] sm:$0xff pattern:$0x75316420] }
  0x18   : > { %779 = vmatmul.msk.f32.vlgmr.msra.gmra.mxu2 %vm292_vm1, %v276_v5  ;;  %781 = vmatmul.msk.f32.vlgmr.msra.gmra.mxu3 %vm292_vm1, %v276_v5  ;;  %v289_v10 = vld.sshfl [vmem:[#allocation1 + $0x8] sm:$0xff pattern:$0x75316420] }
  0x19   : > { %774 = vmatpush.msk.msra.mxu0 %vm296_vm0, %v288_v9  ;;  %776 = vmatpush.msk.msra.mxu1 %vm296_vm0, %v289_v10  ;;  %394 = vst [vmem:[#allocation1] ss:$2 sm:$0xff] %v274_v6 }
  0x1a   : > { %775 = vmatmul.msk.f32.vlgmr.msra.gmra.mxu0 %vm292_vm1, %v276_v5  ;;  %777 = vmatmul.msk.f32.vlgmr.msra.gmra.mxu1 %vm292_vm1, %v276_v5 }
  0x1e   : > { %v399_v12 = vld.sshfl [vmem:[#allocation1 + $0x10] sm:$0xff pattern:$0x75316420]  ;;  %v400_v13 = vld.sshfl [vmem:[#allocation1 + $0x18] sm:$0xff pattern:$0x75316420] }
  0x1f   : > { %786 = vmatpush.msk.msrb.mxu2 %vm296_vm0, %v399_v12  ;;  %788 = vmatpush.msk.msrb.mxu3 %vm296_vm0, %v400_v13 }
  0x20   : > { %787 = vmatmul.msk.f32.vlgmr.msrb.gmra.mxu2 %vm292_vm1, %v385_v11  ;;  %789 = vmatmul.msk.f32.vlgmr.msrb.gmra.mxu3 %vm292_vm1, %v385_v11  ;;  %v397_v14 = vld.sshfl [vmem:[#allocation1] sm:$0xff pattern:$0x75316420]  ;;  %v398_v15 = vld.sshfl [vmem:[#allocation1 + $0x8] sm:$0xff pattern:$0x75316420] }
  0x21   : > { %782 = vmatpush.msk.msrb.mxu0 %vm296_vm0, %v397_v14  ;;  %784 = vmatpush.msk.msrb.mxu1 %vm296_vm0, %v398_v15 }
  0x22   : > { %783 = vmatmul.msk.f32.vlgmr.msrb.gmra.mxu0 %vm292_vm1, %v385_v11  ;;  %785 = vmatmul.msk.f32.vlgmr.msrb.gmra.mxu1 %vm292_vm1, %v385_v11 }
  0x7f   : > { %v390_v20 = vpop.permute.xlu0 %389 }
  0x97   : > { %v907_v16 = vpop.f32.mrf.mxu0  ;;  %v909_v17 = vpop.f32.mrf.mxu1 }
  0x9b   : > { %v911_v18 = vpop.f32.mrf.mxu2  ;;  %v913_v19 = vpop.f32.mrf.mxu3 }
  0x9f   : > { %v429_v21 = vpop.f32.mrf.mxu0  ;;  %v449_v22 = vpop.f32.mrf.mxu1 }
  0xa0   : > { %v430_v23 = vadd.f32 %v429_v21, %v390_v20  ;;  %v450_v24 = vadd.f32 %v449_v22, %v390_v20 }
  0xa3   : > { %v469_v25 = vpop.f32.mrf.mxu2  ;;  %v489_v26 = vpop.f32.mrf.mxu3 }
  0xa4   : > { %v470_v27 = vadd.f32 %v469_v25, %v390_v20  ;;  %v490_v28 = vadd.f32 %v489_v26, %v390_v20 }
  0xa6   : > { %v500_v29 = vmax.f32 %v430_v23, %v470_v27  ;;  %v501_v30 = vmax.f32 %v450_v24, %v490_v28 }
  0xa8   : > { %521 = vst.sshfl [vmem:[#allocation1] sm:$0xff pattern:$0x75316420] %v500_v29  ;;  %559 = vrot.lane.b32.xlu1 %v501_v30, %s828_s12  ;;  %505 = vrot.lane.b32.xlu0 %v500_v29, %s828_s12  ;;  %v563_v31 = vrot.slane %v501_v30, 6  ;;  %v510_v32 = vrot.slane %v500_v29, 6  ;;  %v514_v38 = vrot.slane %v500_v29, 7 }
  0xa9   : > { %557 = vst.msk [vmem:[#allocation3 + $0x2] sm:$0x1] %vm502_vm2, %v501_v30  ;;  %v567_v41 = vrot.slane %v501_v30, 7 }
  0xaa   : > { %v564_v33 = vrot.slane %v563_v31, 4  ;;  %503 = vst.msk [vmem:[#allocation3] sm:$0x1] %vm502_vm2, %v500_v29  ;;  %v919_v34 = vrot.slane %v510_v32, 4  ;;  %v929_v39 = vrot.slane %v514_v38, 4 }
  0xab   : > { %v568_v42 = vrot.slane %v567_v41, 4 }
  0xac   : > { %566 = vst.msk [vmem:[#allocation4 + $0x2] sm:$0x1] %vm502_vm2, %v564_v33 }
  0xad   : > { %513 = vst.msk [vmem:[#allocation4] sm:$0x1] %vm502_vm2, %v919_v34 }
  0xaf   : > { %v523_v36 = vld [vmem:[#allocation1 + $0x1] ss:$2 sm:$0xff] }
  0xb0   : > { %280 = vperm.xlu1 %814, %v277_v35   ;;  %526 = vst.sshfl [vmem:[#allocation1] sm:$0xff pattern:$0x75316420] %v500_v29 }
  0xb1   : > { %525 = vst.msk [vmem:[#allocation4 + $0x4] sm:$0x1] %vm502_vm2, %v523_v36 }
  0xb7   : > { %v528_v37 = vld [vmem:[#allocation1 + $0x1] ss:$2 sm:$0xff] }
  0xb8   : > { %589 = vrot.lane.b32.xlu1 %v564_v33, %s828_s12  ;;  %543 = vst.sshfl [vmem:[#allocation1] sm:$0xff pattern:$0x75316420] %v500_v29  ;;  %v790_v47 = vrot.slane %v528_v37, 9 }
  0xbf   : > { %v545_v40 = vld [vmem:[#allocation1 + $0x1] ss:$2 sm:$0xff] }
  0xc0   : > { %546 = vrot.lane.b32.xlu0 %v545_v40, %s828_s12  ;;  %550 = vst.sshfl [vmem:[#allocation1] sm:$0xff pattern:$0x75316420] %v500_v29  ;;  %516 = vrot.lane.b32.xlu1 %v929_v39, %s828_s12 }
  0xc7   : > { %v552_v43 = vld [vmem:[#allocation1 + $0x1] ss:$2 sm:$0xff] }
  0xc8   : > { %573 = vst.sshfl [vmem:[#allocation1] sm:$0xff pattern:$0x75316420] %v501_v30  ;;  %569 = vrot.lane.b32.xlu1 %v568_v42, %s828_s12  ;;  %v791_v58 = vrot.slane %v552_v43, 9 }
  0xcf   : > { %v575_v44 = vld [vmem:[#allocation1 + $0x1] ss:$2 sm:$0xff] }
  0xd0   : > { %578 = vst.sshfl [vmem:[#allocation1] sm:$0xff pattern:$0x75316420] %v501_v30 }
  0xd1   : > { %577 = vst.msk [vmem:[#allocation4 + $0x6] sm:$0x1] %vm502_vm2, %v575_v44 }
  0xd7   : > { %v580_v45 = vld [vmem:[#allocation1 + $0x1] ss:$2 sm:$0xff] }
  0xd8   : > { %595 = vst.sshfl [vmem:[#allocation1] sm:$0xff pattern:$0x75316420] %v501_v30  ;;  %v792_v4 = vrot.slane %v580_v45, 9 }
  0xdf   : > { %v597_v46 = vld [vmem:[#allocation1 + $0x1] ss:$2 sm:$0xff] }
  0xe0   : > { %598 = vrot.lane.b32.xlu0 %v597_v46, %s828_s12  ;;  %602 = vst.sshfl [vmem:[#allocation1] sm:$0xff pattern:$0x75316420] %v501_v30 }
  0xe7   : > { %v604_v62 = vld [vmem:[#allocation1 + $0x1] ss:$2 sm:$0xff] }
  0xe8   : > { %531 = vrot.lane.b32.xlu0 %v790_v47, %s828_s12  ;;  %v793_v0 = vrot.slane %v604_v62, 9 }
 0x11a   : > { %v560_v48 = vpop.permute.xlu1 %559  ;;  %v506_v49 = vpop.permute.xlu0 %505 }
 0x11b   : > { %562 = vst.msk [vmem:[#allocation3 + $0x1] sm:$0x2] %vm508_vm3, %v560_v48 }
 0x11c   : > { %587 = vst.msk [vmem:[#allocation3 + $0x3] sm:$0x1] %vm502_vm2, %v560_v48 }
 0x11d   : > { %588 = vst.msk [vmem:[#allocation3 + $0x2] sm:$0x2] %vm508_vm3, %v501_v30 }
 0x11e   : > { %509 = vst.msk [vmem:[#allocation3 - $0x1] sm:$0x2] %vm508_vm3, %v506_v49 }
 0x11f   : > { %535 = vst.msk [vmem:[#allocation3 + $0x1] sm:$0x1] %vm502_vm2, %v506_v49 }
 0x120   : > { %536 = vst.msk [vmem:[#allocation3] sm:$0x2] %vm508_vm3, %v500_v29 }
 0x122   : > { %v281_v50 = vpop.permute.xlu1 %280 }
 0x123   : > { %v323_v51 = vadd.f32 %v907_v16, %v281_v50  ;;  %v343_v52 = vadd.f32 %v909_v17, %v281_v50  ;;  %v363_v53 = vadd.f32 %v911_v18, %v281_v50  ;;  %v383_v54 = vadd.f32 %v913_v19, %v281_v50 }
 0x125   : > { %492 = vst [vmem:[#allocation2] sm:$0x1] %v323_v51 }
 0x126   : > { %493 = vst [vmem:[#allocation2 + $0x1] sm:$0x1] %v343_v52 }
 0x127   : > { %494 = vst [vmem:[#allocation2 + $0x2] sm:$0x1] %v363_v53  ;;  %v610_v55 = vld [vmem:[#allocation3] sm:$0xf] }
 0x128   : > { %495 = vst [vmem:[#allocation2 + $0x3] sm:$0x1] %v383_v54  ;;  %626 = vmatpush.xpose.msra.mxu0 %v610_v55 }
 0x129   : > { %496 = vst [vmem:[#allocation2 + $0x3] sm:$0x2] %v323_v51 }
 0x12a   : > { %497 = vst [vmem:[#allocation2 + $0x4] sm:$0x2] %v343_v52  ;;  %v590_v56 = vpop.permute.xlu1 %589 }
 0x12b   : > { %498 = vst [vmem:[#allocation2 + $0x5] sm:$0x2] %v363_v53 }
 0x12c   : > { %499 = vst [vmem:[#allocation2 + $0x6] sm:$0x2] %v383_v54 }
 0x12d   : > { %592 = vst.msk [vmem:[#allocation4 + $0x3] sm:$0x1] %vm502_vm2, %v590_v56 }
 0x12e   : > { %594 = vst.msk [vmem:[#allocation4 + $0x3] sm:$0x1] %vm519_vm4, %v568_v42 }
 0x132   : > { %v547_v57 = vpop.permute.xlu0 %546  ;;  %v517_v59 = vpop.permute.xlu1 %516 }
 0x133   : > { %v609_v60 = vld [vmem:[#allocation2] sm:$0xff]  ;;  %549 = vst.msk [vmem:[#allocation4 + $0x5] sm:$0x1] %vm502_vm2, %v547_v57 }
 0x134   : > { %627 = vmatmul.f32.vlgmr.msra.gmra.mxu0 %v609_v60  ;;  %556 = vst.msk [vmem:[#allocation4 + $0x5] sm:$0x1] %vm519_vm4, %v791_v58 }
 0x135   : > { %520 = vst.msk [vmem:[#allocation4] sm:$0x1] %vm519_vm4, %v517_v59 }
 0x13a   : > { %v570_v61 = vpop.permute.xlu1 %569 }
 0x13b   : > { %572 = vst.msk [vmem:[#allocation4 + $0x2] sm:$0x1] %vm519_vm4, %v570_v61 }
 0x152   : > { %v599_v63 = vpop.permute.xlu0 %598 }
 0x153   : > { %601 = vst.msk [vmem:[#allocation4 + $0x7] sm:$0x1] %vm502_vm2, %v599_v63 }
 0x154   : > { %608 = vst.msk [vmem:[#allocation4 + $0x7] sm:$0x1] %vm519_vm4, %v793_v0 }
 0x15a   : > { %v532_v1 = vpop.permute.xlu0 %531 }
 0x15b   : > { %534 = vst.msk [vmem:[#allocation4 + $0x4] sm:$0x1] %vm519_vm4, %v532_v1 }
 0x1b1   : > { %v628_v2 = vpop.f32.mrf.mxu0 }
 0x1b2   : > { %v631_v3 = vsel %vm292_vm1, %v628_v2, -inf }
 0x1b3   : > { %632 = vmax.xlane.f32.xlu2 %v631_v3 }
 0x1cb   : > { %537 = vrot.lane.b32.xlu2 %v919_v34, %s828_s12 }
 0x1d3   : > { %583 = vrot.lane.b32.xlu2 %v792_v4, %s828_s12 }
 0x226   : > { %v633_v5 = vpop.xlane.xlu2 %632 }
 0x227   : > { %v634_v6 = vsub.f32 %v628_v2, %v633_v5 }
 0x229   : > { %v635_v7 = vmul.f32 1.442695, %v634_v6 }
 0x22b   : > { %815 = vpow2.f32 %v635_v7 }
 0x22e   : > { %v538_v8 = vpop.permute.xlu2 %537 }
 0x22f   : > { %540 = vst.msk [vmem:[#allocation4 + $0x1] sm:$0x1] %vm502_vm2, %v538_v8 }
 0x230   : > { %542 = vst.msk [vmem:[#allocation4 + $0x1] sm:$0x1] %vm519_vm4, %v929_v39 }
 0x231   : > { %v816_v9 = vpop.eup %815 }
 0x232   : > { %v637_v10 = vsel %vm292_vm1, %v816_v9, 0.0 }
 0x233   : > { %638 = vadd.xlane.f32.xlu0 %v637_v10 }
 0x236   : > { %v584_v11 = vpop.permute.xlu2 %583 }
 0x237   : > { %586 = vst.msk [vmem:[#allocation4 + $0x6] sm:$0x1] %vm519_vm4, %v584_v11 }
 0x23e   : > { %v642_v12 = vld [vmem:[#allocation4] sm:$0xff] }
 0x23f   : > { %644 = vst [vmem:[#allocation1] ss:$2 sm:$0xff] %v642_v12 }
 0x246   : > { %v645_v13 = vld.sshfl [vmem:[#allocation1] sm:$0xff pattern:$0x75316420]  ;;  %v646_v14 = vld.sshfl [vmem:[#allocation1 + $0x8] sm:$0xff pattern:$0x75316420] }
 0x247   : > { %794 = vmatpush.msk.msra.mxu1 %vm296_vm0, %v645_v13  ;;  %796 = vmatpush.msk.msra.mxu2 %vm296_vm0, %v646_v14 }
 0x2a6   : > { %v639_v15 = vpop.xlane.xlu0 %638 }
 0x2a7   : > { %817 = vrcp.f32 %v639_v15 }
 0x2ad   : > { %v818_v16 = vpop.eup %817 }
 0x2ae   : > { %v641_v17 = vmul.f32 %v818_v16, %v816_v9 }
 0x2b0   : > { %795 = vmatmul.msk.f32.vlgmr.msra.gmra.mxu1 %vm292_vm1, %v641_v17  ;;  %797 = vmatmul.msk.f32.vlgmr.msra.gmra.mxu2 %vm292_vm1, %v641_v17 }
 0x32d   : > { %v671_v18 = vpop.f32.mrf.mxu1 }
 0x32e   : > { %694 = vst [vmem:[%s271_s17] sm:$0xff] %v671_v18 }
 0x333   : > { %v691_v19 = vpop.f32.mrf.mxu2 }
 0x334   : > { %695 = vst [vmem:[%s271_s17 + $0x8] sm:$0xff] %v691_v19 }
 0x335 PF: > { %s16_s21 = sadd.s32 1, %s825_s21  }
 0x336   : > { %p13_p4 = scmp.ge.s32.totalorder %s16_s21, 4  }
 0x338   :  { %15 = sbr.rel (!%p13_p4) target bundleno = 1 (0x1), region = 87 }

</bundles_post_ra>
